<compile_context>
chip_gen: v6e
topology: v6e:2x2x1
jax: 0.10.0
libtpu: 0.0.40
codegen_flags: <defaults>
</compile_context>

<pallas_src>
import functools

import jax
import jax.numpy as jnp
from jax.experimental import pallas as pl
from jax.experimental.pallas import tpu as pltpu


def _round_up(x, m):
    return (x + m - 1) // m * m


def _cdiv(a, b):
    return -(-a // b)


def _vmem_capacity_bytes():
    """Physical VMEM per TensorCore (generation-aware), conservative fallback."""
    try:
        return int(pltpu.get_tpu_info().vmem_capacity_bytes)
    except Exception:
        return 64 * 1024 * 1024  # v7x per-TC size: safe lower bound everywhere


def _num_tensorcores():
    """TensorCores per chip (2 on v7x megacore, 1 on v5e/v6e). Best effort."""
    try:
        d = jax.devices()[0]
        return max(1, int(getattr(d, "num_cores", 1) or 1))
    except Exception:
        return 1


def _mlp_kernel(x_ref, w1_ref, b1_ref, w2_ref, b2_ref, o_ref, acc_ref):
    """One (batch-tile, H-slab) step of out = relu(x @ W1 + b1) @ W2 + b2.

    Grid axis 0: batch tiles ("parallel").  Grid axis 1: hidden-dim slabs
    ("arbitrary", reduction): partial results accumulate in f32 scratch; bias2
    add + store happen on the last slab.  Matmuls accumulate in f32 on the
    MXU; the bias/ReLU epilogue stays in f32 (v5e has no bf16 VPU).
    """
    h_idx = pl.program_id(1)

    x = x_ref[...].astype(w1_ref.dtype)                # cast to MXU dtype in-kernel
    h = jnp.dot(x, w1_ref[...], preferred_element_type=jnp.float32)
    h = jnp.maximum(h + b1_ref[...], 0.0)              # f32 epilogue (v5e-safe)
    h = h.astype(w2_ref.dtype)
    part = jnp.dot(h, w2_ref[...], preferred_element_type=jnp.float32)

    @pl.when(h_idx == 0)
    def _():
        acc_ref[...] = part

    @pl.when(h_idx != 0)
    def _():
        acc_ref[...] += part

    @pl.when(h_idx == pl.num_programs(1) - 1)
    def _():
        o_ref[...] = (acc_ref[...] + b2_ref[...]).astype(o_ref.dtype)


@functools.partial(jax.jit, static_argnames=("block_b", "use_bf16", "h_tiles"))
def prediction_forward(x, w1, b1, w2, b2, *, block_b=None, use_bf16=True,
                       h_tiles=None):
    """Pallas-backed forward pass of Prediction(projection_size).

    x : (..., D) float
    w1: (D, H), b1: (1, H) or (H,)
    w2: (H, D), b2: (1, D) or (D,)
    returns (..., D) in x.dtype
    """
    orig_shape = x.shape
    D = orig_shape[-1]
    x2 = x.reshape(-1, D)
    B = x2.shape[0]
    H = w1.shape[1]
    out_dtype = x.dtype

    # ---- Lane-dense feature dims (multiples of 128). ----
    Dp = _round_up(D, 128)
    Hp = _round_up(H, 128)

    w_dtype = jnp.bfloat16 if use_bf16 else jnp.float32
    wbytes = 2 if use_bf16 else 4
    xbytes = jnp.dtype(x.dtype).itemsize
    obytes = jnp.dtype(out_dtype).itemsize

    # Min sublane multiple for the batch-tiled arrays (x tile / out tile).
    sub = 8 if (xbytes >= 4 and obytes >= 4) else 16

    capacity = _vmem_capacity_bytes()
    budget = capacity // 2          # per-TC; megacore duplicates resident weights
    if block_b is None:
        block_b = 512 if capacity >= 96 * 1024 * 1024 else 256

    # ---- Batch tile selection. ----
    bq = _round_up(B, sub)
    bb = _round_up(min(block_b, bq), sub)
    # Keep >=2 grid steps only when there are >=2 TensorCores to feed (v7x).
    if _num_tensorcores() >= 2 and bq // bb < 2 and B >= 2 * sub:
        bb = _round_up(_cdiv(B, 2), sub)

    # ---- VMEM-budgeted (bb, H-slab) search: tile H before shrinking bb. ----
    def _th_for(nh):
        return _round_up(_cdiv(Hp, nh), 128)

    def _est_bytes(b, th):
        weights = 2 * ((Dp * th + th * Dp) * wbytes + th * 4 + Dp * 4)  # dbl-buffered
        tiles = 2 * b * Dp * xbytes + 2 * b * Dp * obytes               # dbl-buffered x/out
        scratch = b * Dp * 4                                            # f32 accumulator
        live = b * th * 4 + b * th * wbytes + b * Dp * 4                # intermediates
        return weights + tiles + scratch + live

    nh = 1 if h_tiles is None else max(1, int(h_tiles))
    while _est_bytes(bb, _th_for(nh)) > budget:
        if _th_for(nh) > 128:
            nh *= 2
        elif bb > sub:
            bb = max(sub, _round_up(bb // 2, sub))
            nh = 1
        else:
            break  # best effort; explicit vmem_limit_bytes below still applies

    tH = _th_for(nh)
    nh = _cdiv(Hp, tH)
    HpT = nh * tH

    Bp = _round_up(B, bb)
    grid = (Bp // bb, nh)

    # ---- Pad operands (zeros are inert through Linear -> ReLU -> Linear). ----
    # x is NOT cast in the wrapper (saves an HBM round trip); cast in-kernel.
    xp = x2 if (Bp == B and Dp == D) else jnp.pad(x2, ((0, Bp - B), (0, Dp - D)))
    w1p = jnp.pad(w1, ((0, Dp - D), (0, HpT - H))).astype(w_dtype)
    w2p = jnp.pad(w2, ((0, HpT - H), (0, Dp - D))).astype(w_dtype)
    b1p = jnp.pad(b1.reshape(1, H), ((0, 0), (0, HpT - H))).astype(jnp.float32)
    b2p = jnp.pad(b2.reshape(1, D), ((0, 0), (0, Dp - D))).astype(jnp.float32)

    est = _est_bytes(bb, tH)
    vmem_limit = int(min(int(capacity * 0.9),
                         max(32 * 1024 * 1024, est + 8 * 1024 * 1024)))

    cost = pl.CostEstimate(
        flops=4 * B * D * H,  # two matmuls: 2*B*D*H each (unpadded dims)
        transcendentals=0,
        bytes_accessed=(x2.size * xbytes + w1.size * wbytes + w2.size * wbytes
                        + (H + D) * 4 + B * D * obytes),
    )

    out = pl.pallas_call(
        _mlp_kernel,
        out_shape=jax.ShapeDtypeStruct((Bp, Dp), out_dtype),
        grid_spec=pltpu.PrefetchScalarGridSpec(
            num_scalar_prefetch=0,
            grid=grid,
            in_specs=[
                pl.BlockSpec((bb, Dp), lambda i, h: (i, 0)),   # x tile (resident over h)
                pl.BlockSpec((Dp, tH), lambda i, h: (0, h)),   # W1 H-slab
                pl.BlockSpec((1, tH), lambda i, h: (0, h)),    # b1 H-slab
                pl.BlockSpec((tH, Dp), lambda i, h: (h, 0)),   # W2 H-slab
                pl.BlockSpec((1, Dp), lambda i, h: (0, 0)),    # b2
            ],
            out_specs=pl.BlockSpec((bb, Dp), lambda i, h: (i, 0)),
            scratch_shapes=[pltpu.VMEM((bb, Dp), jnp.float32)],
        ),
        compiler_params=pltpu.CompilerParams(
            dimension_semantics=("parallel", "arbitrary"),
            vmem_limit_bytes=vmem_limit,
        ),
        cost_estimate=cost,
    )(xp, w1p, b1p, w2p, b2p)

    out = out[:B, :D]
    return out.reshape(orig_shape[:-1] + (D,))


def init_prediction_params(key, projection_size, hidden_size=None,
                           dtype=jnp.float32):
    """Deterministic PyTorch-Linear-style init: U(-1/sqrt(fan_in), 1/sqrt(fan_in))."""
    if hidden_size is None:
        hidden_size = projection_size
    k1, k2, k3, k4 = jax.random.split(key, 4)
    lim1 = 1.0 / jnp.sqrt(projection_size)
    lim2 = 1.0 / jnp.sqrt(hidden_size)
    w1 = jax.random.uniform(k1, (projection_size, hidden_size), dtype,
                            minval=-lim1, maxval=lim1)
    b1 = jax.random.uniform(k2, (1, hidden_size), dtype,
                            minval=-lim1, maxval=lim1)
    w2 = jax.random.uniform(k3, (hidden_size, projection_size), dtype,
                            minval=-lim2, maxval=lim2)
    b2 = jax.random.uniform(k4, (1, projection_size), dtype,
                            minval=-lim2, maxval=lim2)
    return w1, b1, w2, b2


if __name__ == "__main__":
    key = jax.random.PRNGKey(0)
    kx, kp, kx2, kp2 = jax.random.split(key, 4)

    # ---- Case 1: module-default small shapes (resident-weight path). ----
    projection_size = 32
    batch = 16
    x = jax.random.normal(kx, (batch, projection_size), dtype=jnp.float32)
    w1, b1, w2, b2 = init_prediction_params(kp, projection_size)
    ref = jnp.maximum(x @ w1 + b1, 0.0) @ w2 + b2

    out_f32 = jax.block_until_ready(
        prediction_forward(x, w1, b1, w2, b2, use_bf16=False))
    assert out_f32.shape == (batch, projection_size)
    assert jnp.allclose(out_f32, ref, atol=1e-4, rtol=1e-4), "f32 mismatch vs reference"

    out_bf16 = jax.block_until_ready(
        prediction_forward(x, w1, b1, w2, b2, use_bf16=True))
    assert out_bf16.shape == (batch, projection_size)
    assert jnp.allclose(out_bf16, ref, atol=5e-2, rtol=5e-2), "bf16 mismatch vs reference"

    # ---- Case 2: exercise the H-tiled accumulator path + multi batch-tile grid. ----
    projection_size2 = 256
    batch2 = 32
    x2 = jax.random.normal(kx2, (batch2, projection_size2), dtype=jnp.float32)
    w1b, b1b, w2b, b2b = init_prediction_params(kp2, projection_size2)
    ref2 = jnp.maximum(x2 @ w1b + b1b, 0.0) @ w2b + b2b
    out2 = jax.block_until_ready(
        prediction_forward(x2, w1b, b1b, w2b, b2b, use_bf16=True,
                           block_b=16, h_tiles=2))
    assert out2.shape == (batch2, projection_size2)
    assert jnp.allclose(out2, ref2, atol=5e-2, rtol=5e-2), "H-tiled path mismatch vs reference"

    print("KERNEL_OK")
</pallas_src>

<mosaic_0001>
module attributes {stable_mosaic.version = 11 : i64} {
  func.func @_mlp_kernel(%arg0: i32, %arg1: i32, %arg2: memref<16x128xf32, #tpu.memory_space<vmem>>, %arg3: memref<128x128xf32, #tpu.memory_space<vmem>>, %arg4: memref<1x128xf32, #tpu.memory_space<vmem>>, %arg5: memref<128x128xf32, #tpu.memory_space<vmem>>, %arg6: memref<1x128xf32, #tpu.memory_space<vmem>>, %arg7: memref<16x128xf32, #tpu.memory_space<vmem>>, %arg8: memref<16x128xf32, #tpu.memory_space<vmem>>) attributes {dimension_semantics = [#tpu.dimension_semantics<parallel>, #tpu.dimension_semantics<arbitrary>], iteration_bounds = array<i64: 1, 1>, scalar_prefetch = 0 : i64, scratch_operands = 1 : i64, tpu.core_type = #tpu.core_type<tc>, window_params = [{transform_indices = @transform_0, window_bounds = array<i64: 16, 128>}, {transform_indices = @transform_1, window_bounds = array<i64: 128, 128>}, {transform_indices = @transform_2, window_bounds = array<i64: 1, 128>}, {transform_indices = @transform_3, window_bounds = array<i64: 128, 128>}, {pipeline_mode = #tpu.pipeline_mode<synchronous>, transform_indices = @transform_4, window_bounds = array<i64: 1, 128>}, {transform_indices = @transform_5, window_bounds = array<i64: 16, 128>}]} {
    %c0 = arith.constant 0 : index
    %c0_0 = arith.constant 0 : index
    %0 = vector.load %arg2[%c0, %c0_0] : memref<16x128xf32, #tpu.memory_space<vmem>>, vector<16x128xf32>
    %c0_1 = arith.constant 0 : index
    %c0_2 = arith.constant 0 : index
    %1 = vector.load %arg3[%c0_1, %c0_2] : memref<128x128xf32, #tpu.memory_space<vmem>>, vector<128x128xf32>
    %cst = arith.constant dense<0.000000e+00> : vector<16x128xf32>
    %2 = tpu.matmul %0, %1, %cst {dimension_numbers = #tpu.dot_dimension_numbers<[1], [0], [0], [1], [0, 0, 1, 1], [], []>} : vector<16x128xf32>, vector<128x128xf32>, vector<16x128xf32> -> vector<16x128xf32>
    %c0_3 = arith.constant 0 : index
    %c0_4 = arith.constant 0 : index
    %3 = vector.load %arg4[%c0_3, %c0_4] : memref<1x128xf32, #tpu.memory_space<vmem>>, vector<1x128xf32>
    %4 = vector.broadcast %3 : vector<1x128xf32> to vector<16x128xf32>
    %5 = arith.addf %2, %4 : vector<16x128xf32>
    %cst_5 = arith.constant 0.000000e+00 : f32
    %6 = vector.broadcast %cst_5 : f32 to vector<16x128xf32>
    %7 = arith.maximumf %5, %6 : vector<16x128xf32>
    %c0_6 = arith.constant 0 : index
    %c0_7 = arith.constant 0 : index
    %8 = vector.load %arg5[%c0_6, %c0_7] : memref<128x128xf32, #tpu.memory_space<vmem>>, vector<128x128xf32>
    %cst_8 = arith.constant dense<0.000000e+00> : vector<16x128xf32>
    %9 = tpu.matmul %7, %8, %cst_8 {dimension_numbers = #tpu.dot_dimension_numbers<[1], [0], [0], [1], [0, 0, 1, 1], [], []>} : vector<16x128xf32>, vector<128x128xf32>, vector<16x128xf32> -> vector<16x128xf32>
    %c0_i32 = arith.constant 0 : i32
    %10 = arith.cmpi eq, %arg1, %c0_i32 : i32
    %11 = arith.extui %10 : i1 to i32
    %c0_i32_9 = arith.constant 0 : i32
    %12 = arith.cmpi ne, %11, %c0_i32_9 : i32
    scf.if %12 {
      %c0_14 = arith.constant 0 : index
      %c0_15 = arith.constant 0 : index
      %19 = vector.load %arg8[%c0_14, %c0_15] : memref<16x128xf32, #tpu.memory_space<vmem>>, vector<16x128xf32>
      tpu.vector_store %arg8[%c0_14, %c0_15], %9 {strides = array<i32>} : memref<16x128xf32, #tpu.memory_space<vmem>>, vector<16x128xf32>,
    } else {
    }
    %c0_i32_10 = arith.constant 0 : i32
    %13 = arith.cmpi ne, %arg1, %c0_i32_10 : i32
    %14 = arith.extui %13 : i1 to i32
    %c0_i32_11 = arith.constant 0 : i32
    %15 = arith.cmpi ne, %14, %c0_i32_11 : i32
    scf.if %15 {
      %c0_14 = arith.constant 0 : index
      %c0_15 = arith.constant 0 : index
      %19 = vector.load %arg8[%c0_14, %c0_15] : memref<16x128xf32, #tpu.memory_space<vmem>>, vector<16x128xf32>
      %20 = arith.addf %19, %9 : vector<16x128xf32>
      %c0_16 = arith.constant 0 : index
      %c0_17 = arith.constant 0 : index
      %21 = vector.load %arg8[%c0_16, %c0_17] : memref<16x128xf32, #tpu.memory_space<vmem>>, vector<16x128xf32>
      tpu.vector_store %arg8[%c0_16, %c0_17], %20 {strides = array<i32>} : memref<16x128xf32, #tpu.memory_space<vmem>>, vector<16x128xf32>,
    } else {
    }
    %c0_i32_12 = arith.constant 0 : i32
    %16 = arith.cmpi eq, %arg1, %c0_i32_12 : i32
    %17 = arith.extui %16 : i1 to i32
    %c0_i32_13 = arith.constant 0 : i32
    %18 = arith.cmpi ne, %17, %c0_i32_13 : i32
    scf.if %18 {
      %c0_14 = arith.constant 0 : index
      %c0_15 = arith.constant 0 : index
      %19 = vector.load %arg8[%c0_14, %c0_15] : memref<16x128xf32, #tpu.memory_space<vmem>>, vector<16x128xf32>
      %c0_16 = arith.constant 0 : index
      %c0_17 = arith.constant 0 : index
      %20 = vector.load %arg6[%c0_16, %c0_17] : memref<1x128xf32, #tpu.memory_space<vmem>>, vector<1x128xf32>
      %21 = vector.broadcast %20 : vector<1x128xf32> to vector<16x128xf32>
      %22 = arith.addf %19, %21 : vector<16x128xf32>
      %c0_18 = arith.constant 0 : index
      %c0_19 = arith.constant 0 : index
      %23 = vector.load %arg7[%c0_18, %c0_19] : memref<16x128xf32, #tpu.memory_space<vmem>>, vector<16x128xf32>
      tpu.vector_store %arg7[%c0_18, %c0_19], %22 {strides = array<i32>} : memref<16x128xf32, #tpu.memory_space<vmem>>, vector<16x128xf32>,
    } else {
    }
    return
  }
  func.func @transform_0(%arg0: i32, %arg1: i32) -> (i32, i32) {
    %c0_i32 = arith.constant 0 : i32
    %c0_i32_0 = arith.constant 0 : i32
    return %arg0, %c0_i32 : i32, i32
  }
  func.func @transform_1(%arg0: i32, %arg1: i32) -> (i32, i32) {
    %c0_i32 = arith.constant 0 : i32
    %c0_i32_0 = arith.constant 0 : i32
    return %c0_i32, %arg1 : i32, i32
  }
  func.func @transform_2(%arg0: i32, %arg1: i32) -> (i32, i32) {
    %c0_i32 = arith.constant 0 : i32
    %c0_i32_0 = arith.constant 0 : i32
    return %c0_i32, %arg1 : i32, i32
  }
  func.func @transform_3(%arg0: i32, %arg1: i32) -> (i32, i32) {
    %c0_i32 = arith.constant 0 : i32
    %c0_i32_0 = arith.constant 0 : i32
    return %arg1, %c0_i32 : i32, i32
  }
  func.func @transform_4(%arg0: i32, %arg1: i32) -> (i32, i32) {
    %c0_i32 = arith.constant 0 : i32
    %c0_i32_0 = arith.constant 0 : i32
    %c0_i32_1 = arith.constant 0 : i32
    return %c0_i32, %c0_i32_0 : i32, i32
  }
  func.func @transform_5(%arg0: i32, %arg1: i32) -> (i32, i32) {
    %c0_i32 = arith.constant 0 : i32
    %c0_i32_0 = arith.constant 0 : i32
    return %arg0, %c0_i32 : i32, i32
  }
}

</mosaic_0001>

<bundles_post_ra>
// kernel: prediction_forward.1
= control target key start
LH: loop header
LB: loop body
LE: loop exit
PB: predicated region body
PF: predicated region fallthrough
CT: control target
= control target key end

     0   :  { %s539_s0 = inlined_call_operand.vmem [shape: f32[16,128], index: 0, kind: input, shape index: {}]   ;;  %s540_s1 = inlined_call_operand.vmem [shape: f32[128,128], index: 1, kind: input, shape index: {}]   ;;  %s541_s2 = inlined_call_operand.vmem [shape: f32[1,128], index: 2, kind: input, shape index: {}]   ;;  %s542_s3 = inlined_call_operand.vmem [shape: f32[128,128], index: 3, kind: input, shape index: {}]   ;;  %s543_s4 = inlined_call_operand.vmem [shape: f32[1,128], index: 4, kind: input, shape index: {}]   ;;  %s544_s5 = inlined_call_operand.hbm [shape: f32[16,128], index: 5, kind: output, shape index: {}]  }
   0x1   :  { %v38_v0 = vld [vmem:[%s540_s1 + $0x78] sm:$0xff]  ;;  %v37_v1 = vld [vmem:[%s540_s1 + $0x70] sm:$0xff]  ;;  %v36_v2 = vld [vmem:[%s540_s1 + $0x68] sm:$0xff] }
   0x2   :  { %300 = vmatprep.subr.mxu0 %v38_v0  ;;  %v35_v3 = vld [vmem:[%s540_s1 + $0x60] sm:$0xff]  ;;  %v34_v5 = vld [vmem:[%s540_s1 + $0x58] sm:$0xff]  ;;  %v137_v7 = vld [vmem:[%s542_s3 + $0x70] sm:$0xff] }
   0x3   :  { %301 = vmatpush3.msra.mxu0 %v38_v0  ;;  %v21_v4 = vld [vmem:[%s539_s0] sm:$0xff]  ;;  %v138_v6 = vld [vmem:[%s542_s3 + $0x78] sm:$0xff]  ;;  %v33_v8 = vld [vmem:[%s540_s1 + $0x50] sm:$0xff] }
   0x4   :  { %302 = vmatprep.subr.mxu0 %v37_v1  ;;  %332 = vmatprep.mubr.f32.mxu0 %v21_v4  ;;  %v136_v9 = vld [vmem:[%s542_s3 + $0x68] sm:$0xff]  ;;  %v135_v11 = vld [vmem:[%s542_s3 + $0x60] sm:$0xff] }
   0x5   :  { %303 = vmatpush3.msra.mxu0 %v37_v1  ;;  %335 = vmatprep.subr.mxu1 %v138_v6  ;;  %v32_v10 = vld [vmem:[%s540_s1 + $0x48] sm:$0xff] }
   0x6   :  { %304 = vmatprep.subr.mxu0 %v36_v2  ;;  %336 = vmatpush3.msra.mxu1 %v138_v6 }
   0x7   :  { %305 = vmatpush3.msra.mxu0 %v36_v2  ;;  %337 = vmatprep.subr.mxu1 %v137_v7 }
   0x8   :  { %306 = vmatprep.subr.mxu0 %v35_v3  ;;  %338 = vmatpush3.msra.mxu1 %v137_v7 }
   0x9   :  { %307 = vmatpush3.msra.mxu0 %v35_v3 }
   0xa   :  { %308 = vmatprep.subr.mxu0 %v34_v5 }
   0xb   :  { %309 = vmatpush3.msra.mxu0 %v34_v5 }
   0xc   :  { %10 = vsyncpa [#allocation4], 0  ;;  %310 = vmatprep.subr.mxu0 %v33_v8  ;;  %339 = vmatprep.subr.mxu1 %v136_v9  ;;  %v31_v12 = vld [vmem:[%s540_s1 + $0x40] sm:$0xff]  ;;  %v134_v13 = vld [vmem:[%s542_s3 + $0x58] sm:$0xff] }
   0xd   :  { %311 = vmatpush3.msra.mxu0 %v33_v8  ;;  %340 = vmatpush3.msra.mxu1 %v136_v9  ;;  %v30_v14 = vld [vmem:[%s540_s1 + $0x38] sm:$0xff]  ;;  %v133_v15 = vld [vmem:[%s542_s3 + $0x50] sm:$0xff]  ;;  %v132_v17 = vld [vmem:[%s542_s3 + $0x48] sm:$0xff] }
   0xe   :  { %312 = vmatprep.subr.mxu0 %v32_v10  ;;  %341 = vmatprep.subr.mxu1 %v135_v11  ;;  %v29_v16 = vld [vmem:[%s540_s1 + $0x30] sm:$0xff]  ;;  %v28_v18 = vld [vmem:[%s540_s1 + $0x28] sm:$0xff]  ;;  %v131_v19 = vld [vmem:[%s542_s3 + $0x40] sm:$0xff] }
   0xf   :  { %313 = vmatpush3.msra.mxu0 %v32_v10  ;;  %342 = vmatpush3.msra.mxu1 %v135_v11  ;;  %v27_v20 = vld [vmem:[%s540_s1 + $0x20] sm:$0xff]  ;;  %v130_v21 = vld [vmem:[%s542_s3 + $0x38] sm:$0xff]  ;;  %v129_v23 = vld [vmem:[%s542_s3 + $0x30] sm:$0xff] }
  0x10   :  { %314 = vmatprep.subr.mxu0 %v31_v12  ;;  %343 = vmatprep.subr.mxu1 %v134_v13  ;;  %v26_v22 = vld [vmem:[%s540_s1 + $0x18] sm:$0xff]  ;;  %v25_v24 = vld [vmem:[%s540_s1 + $0x10] sm:$0xff]  ;;  %v128_v25 = vld [vmem:[%s542_s3 + $0x28] sm:$0xff] }
  0x11   :  { %315 = vmatpush3.msra.mxu0 %v31_v12  ;;  %344 = vmatpush3.msra.mxu1 %v134_v13  ;;  %v24_v26 = vld [vmem:[%s540_s1 + $0x8] sm:$0xff]  ;;  %v127_v27 = vld [vmem:[%s542_s3 + $0x20] sm:$0xff]  ;;  %v126_v30 = vld [vmem:[%s542_s3 + $0x18] sm:$0xff] }
  0x12   :  { %316 = vmatprep.subr.mxu0 %v30_v14  ;;  %345 = vmatprep.subr.mxu1 %v133_v15  ;;  %v23_v28 = vld [vmem:[%s540_s1] sm:$0xff]  ;;  %v22_v29 = vld [vmem:[%s539_s0 + $0x8] sm:$0xff]  ;;  %v125_v31 = vld [vmem:[%s542_s3 + $0x10] sm:$0xff] }
  0x13   :  { %317 = vmatpush3.msra.mxu0 %v30_v14  ;;  %346 = vmatpush3.msra.mxu1 %v133_v15  ;;  %v124_v32 = vld [vmem:[%s542_s3 + $0x8] sm:$0xff]  ;;  %v123_v33 = vld [vmem:[%s542_s3] sm:$0xff]  ;;  %s395_s3 = smov [#allocation3]  }
  0x14   :  { %318 = vmatprep.subr.mxu0 %v29_v16  ;;  %347 = vmatprep.subr.mxu1 %v132_v17  ;;  %v262_v34 = vld [vmem:[%s541_s2] ss:$0 sm:$0xff]  ;;  %s251_s13 = sshll.u32 %s395_s3, 4  ;;  %s252_s13 = int_to_ptr.vmem [resolvable:$true] %s251_s13 }
  0x15   :  { %319 = vmatpush3.msra.mxu0 %v29_v16  ;;  %348 = vmatpush3.msra.mxu1 %v132_v17  ;;  %v263_v41 = vld [vmem:[%s543_s4] ss:$0 sm:$0xff]  ;;  %s373_s2 = scalar_lea.vmem %s252_s13, 256  ;;  %p378_p1 = scmp.lt.s32.totalorder %s252_s13, %s252_s13 }
  0x16   :  { %320 = vmatprep.subr.mxu0 %v28_v18  ;;  %349 = vmatprep.subr.mxu1 %v131_v19  ;;  %p374_p0 = scmp.ne.s32.totalorder %s252_s13, %s373_s2  ;;  %p379_p2 = scmp.lt.s32.totalorder %s373_s2, %s373_s2 }
  0x17   :  { %321 = vmatpush3.msra.mxu0 %v28_v18  ;;  %350 = vmatpush3.msra.mxu1 %v131_v19 }
  0x18   :  { %322 = vmatprep.subr.mxu0 %v27_v20  ;;  %351 = vmatprep.subr.mxu1 %v130_v21  ;;  %p380_p3 = por %p379_p2, %p378_p1 }
  0x19   :  { %323 = vmatpush3.msra.mxu0 %v27_v20  ;;  %352 = vmatpush3.msra.mxu1 %v130_v21 }
  0x1a   :  { %324 = vmatprep.subr.mxu0 %v26_v22  ;;  %353 = vmatprep.subr.mxu1 %v129_v23  ;;  %p381_p4 = pnand %p380_p3, %p374_p0 }
  0x1b   :  { %325 = vmatpush3.msra.mxu0 %v26_v22  ;;  %354 = vmatpush3.msra.mxu1 %v129_v23 }
  0x1c   :  { %326 = vmatprep.subr.mxu0 %v25_v24  ;;  %355 = vmatprep.subr.mxu1 %v128_v25 }
  0x1d   :  { %327 = vmatpush3.msra.mxu0 %v25_v24  ;;  %356 = vmatpush3.msra.mxu1 %v128_v25 }
  0x1e   :  { %328 = vmatprep.subr.mxu0 %v24_v26  ;;  %357 = vmatprep.subr.mxu1 %v127_v27 }
  0x1f   :  { %329 = vmatpush3.msra.mxu0 %v24_v26  ;;  %358 = vmatpush3.msra.mxu1 %v127_v27 }
  0x20   :  { %330 = vmatprep.subr.mxu0 %v23_v28  ;;  %359 = vmatprep.subr.mxu1 %v126_v30 }
  0x21   :  { %331 = vmatpush3.msra.mxu0 %v23_v28  ;;  %360 = vmatpush3.msra.mxu1 %v126_v30 }
  0x22   :  { %333 = vmatmul.mubr.f32.vlgmr.msra.gmra.mxu0 %v22_v29  ;;  %361 = vmatprep.subr.mxu1 %v125_v31 }
  0x23   :  { %362 = vmatpush3.msra.mxu1 %v125_v31 }
  0x24   :  { %363 = vmatprep.subr.mxu1 %v124_v32 }
  0x25   :  { %364 = vmatpush3.msra.mxu1 %v124_v32 }
  0x26   :  { %365 = vmatprep.subr.mxu1 %v123_v33 }
  0x27   :  { %366 = vmatpush3.msra.mxu1 %v123_v33 }
  0xe2   :  { %v334_v35 = vpop.f32.mrf.mxu0 }
  0xe3   :  { %v118_v36 = vadd.f32 %v334_v35, %v262_v34 }
  0xe4   :  { %v112_v37 = vpop.f32.mrf.mxu0 }
  0xe5   :  { %v113_v38 = vadd.f32 %v262_v34, %v112_v37  ;;  %v122_v40 = vmax.f32 %v118_v36, 0.0 }
  0xe7   :  { %v121_v39 = vmax.f32 %v113_v38, 0.0 }
  0xe9   :  { %367 = vmatprep.mubr.f32.mxu1 %v121_v39 }
  0xea   :  { %368 = vmatmul.mubr.f32.vlgmr.msra.gmra.mxu1 %v122_v40 }
 0x1aa   :  { %v369_v42 = vpop.f32.mrf.mxu1 }
 0x1ab   :  { %v243_v43 = vadd.f32 %v369_v42, %v263_v41 }
 0x1ac   :  { %v205_v44 = vpop.f32.mrf.mxu1 }
 0x1ad   :  { %245 = vst [vmem:[#allocation3 + $0x8] sm:$0xff] %v243_v43  ;;  %v242_v45 = vadd.f32 %v263_v41, %v205_v44 }
 0x1af   :  { %244 = vst [vmem:[#allocation3] sm:$0xff] %v242_v45 }
 0x1b0   :  { %384 = shalt.err (!%p381_p4)
}
 0x1b1   :  { %s396_s14 = smov 128   ;;  %s397_s15 = smov 8  }
 0x1b2   :  { %257 = dma.vmem_to_hbm [thread:$0]  %s252_s13, 256, %s544_s5, [#allocation4], %s396_s14, %s396_s14, %s397_s15  }
 0x1b3   :  { %393 = dma.done.wait [#allocation4], 256  }
 0x1b4   :  { %394 = vsyncadd [#allocation4], 4294967040 }
 0x1b5   :  { %261 = vsyncpa [#allocation4], 1 }

</bundles_post_ra>
